<compile_context>
chip_gen: v6e
topology: v6e:2x2x1
jax: 0.10.0
libtpu: 0.0.40
codegen_flags: <defaults>
</compile_context>

<pallas_src>
import functools

import jax
import jax.numpy as jnp
from jax.experimental import pallas as pl
from jax.experimental.pallas import tpu as pltpu


def _mog_netg_kernel(x_ref,
                     w1_ref, b1_ref,
                     w2_ref, b2_ref,
                     w3_ref, b3_ref,
                     w4_ref, b4_ref,
                     w5_ref, b5_ref,
                     out_ref, *, chunks):
    """One batch tile: 5 matmuls (MXU) + 4 tanh (EUP), features-on-sublanes.

    x_ref  : (TB, nz)        native row-major batch tile (no wrapper transpose)
    wN_ref : (out_f, in_f)   PyTorch layout, VMEM-resident across the grid
    bN_ref : (out_f, 1)      f32, broadcast over the lane (batch) axis
    out_ref: (nX, TB)        lane-dense store
    chunks : static ((start, size), ...) sub-tiles (<=512 lanes) bounding vreg
             live ranges.
    """
    cdt = w1_ref.dtype                      # f32, or bf16 for native MXU/EUP path
    w1 = w1_ref[...]; b1 = b1_ref[...]
    w2 = w2_ref[...]; b2 = b2_ref[...]
    w3 = w3_ref[...]; b3 = b3_ref[...]
    w4 = w4_ref[...]; b4 = b4_ref[...]
    w5 = w5_ref[...]; b5 = b5_ref[...]

    for start, size in chunks:              # static Python loop -> static slices
        xb = x_ref[start:start + size, :].astype(cdt)            # (size, nz)
        # Layer 1: contract W1's in_features with x's feature dim (rhs transposed
        # inside the matmul feed) -> (dim, size); f32 accumulation.
        z = jax.lax.dot_general(w1, xb, (((1,), (1,)), ((), ())),
                                preferred_element_type=jnp.float32) + b1
        h = jnp.tanh(z.astype(cdt))
        for w, b in ((w2, b2), (w3, b3), (w4, b4)):
            z = jnp.dot(w, h, preferred_element_type=jnp.float32) + b
            h = jnp.tanh(z.astype(cdt))
        y = jnp.dot(w5, h, preferred_element_type=jnp.float32) + b5
        out_ref[:, start:start + size] = y.astype(out_ref.dtype)


def _round_up(n, m):
    return ((n + m - 1) // m) * m


@functools.partial(jax.jit, static_argnames=("tile_b", "use_bf16"))
def mog_netG_forward(x, params, tile_b=1024, use_bf16=False):
    """Forward pass of mog_netG.

    x:      (B, nz) float32
    params: list of 5 tuples (W, b) with W (out_features, in_features) [PyTorch
            layout] and b (out_features,).
    Returns (B, nX) float32, identical math to the nn.Sequential forward
    (bit-exact path with use_bf16=False; bf16 MXU/EUP operands otherwise).
    """
    B, nz = x.shape
    dim = params[0][0].shape[0]
    nX = params[-1][0].shape[0]

    # ---- batch tiling --------------------------------------------------------
    B_pad128 = _round_up(B, 128)
    tb_cap = max(128, (tile_b // 128) * 128)
    num_tiles = -(-B_pad128 // tb_cap)               # ceil
    if num_tiles == 1 and B_pad128 >= 256:
        num_tiles = 2                                # >=2 grid steps -> v7x megacore
    TB = max(128, _round_up(-(-B_pad128 // num_tiles), 128))
    B_pad = num_tiles * TB
    # <=512-lane in-kernel sub-chunks: (dim, 512) f32 = 16 vregs live per chunk.
    chunks = tuple((s, min(512, TB - s)) for s in range(0, TB, 512))

    # ---- operand prep (no transpose of x; pad only a ragged batch tail) ------
    x = x.astype(jnp.float32)
    if B_pad != B:
        x = jnp.pad(x, ((0, B_pad - B), (0, 0)))     # zero rows: benign, sliced off

    wdt = jnp.bfloat16 if use_bf16 else jnp.float32

    flat_inputs = [x]
    in_specs = [pl.BlockSpec((TB, nz), lambda i: (i, 0))]
    for (w, b) in params:
        b2d = b.reshape(-1, 1).astype(jnp.float32)   # (out_f, 1), f32 bias add
        flat_inputs.extend([w.astype(wdt), b2d])
        # Constant index maps -> weights/biases stay VMEM-resident (no re-DMA).
        in_specs.append(pl.BlockSpec(w.shape, lambda i: (0, 0)))
        in_specs.append(pl.BlockSpec(b2d.shape, lambda i: (0, 0)))

    out_spec = pl.BlockSpec((nX, TB), lambda i: (0, i))

    flops = 2 * B_pad * (nz * dim + 3 * dim * dim + dim * nX)
    transcendentals = 4 * B_pad * dim
    wbytes = 2 if use_bf16 else 4
    weight_bytes = sum(w.size * wbytes + b.size * 4 for (w, b) in params)
    bytes_accessed = B_pad * (nz + nX) * 4 + weight_bytes

    out_t = pl.pallas_call(
        functools.partial(_mog_netg_kernel, chunks=chunks),
        out_shape=jax.ShapeDtypeStruct((nX, B_pad), jnp.float32),
        grid=(num_tiles,),
        in_specs=in_specs,
        out_specs=out_spec,
        compiler_params=pltpu.CompilerParams(
            dimension_semantics=("parallel",),       # megacore sharding on v7x
            vmem_limit_bytes=32 << 20,               # fits v5e/v6e/v7x scoped VMEM
        ),
        cost_estimate=pl.CostEstimate(
            flops=flops,
            transcendentals=transcendentals,
            bytes_accessed=bytes_accessed,
        ),
    )(*flat_inputs)

    return out_t[:, :B].T                            # (B, nX)


def init_params(key, nz, dim, nX):
    """PyTorch-Linear-style init U(-1/sqrt(fan_in), 1/sqrt(fan_in)).

    Weights kept in PyTorch (out_features, in_features) layout; biases 1-D."""
    sizes = [(nz, dim), (dim, dim), (dim, dim), (dim, dim), (dim, nX)]
    params = []
    for (fan_in, fan_out) in sizes:
        key, kw, kb = jax.random.split(key, 3)
        bound = 1.0 / jnp.sqrt(jnp.float32(fan_in))
        w = jax.random.uniform(kw, (fan_out, fan_in), jnp.float32, -bound, bound)
        b = jax.random.uniform(kb, (fan_out,), jnp.float32, -bound, bound)
        params.append((w, b))
    return params


def reference_forward(x, params):
    """Plain-JAX reference of the same MLP (PyTorch semantics: x @ W.T + b)."""
    h = x
    for i, (w, b) in enumerate(params):
        h = h @ w.T + b
        if i < len(params) - 1:
            h = jnp.tanh(h)
    return h


if __name__ == "__main__":
    # Small shapes consistent with the module: nz latent, hidden dim, nX=2 output.
    batch, nz, dim, nX = 8, 8, 32, 2

    key = jax.random.PRNGKey(0)
    key, kx = jax.random.split(key)
    x = jax.random.normal(kx, (batch, nz), jnp.float32)

    params = init_params(key, nz, dim, nX)

    # f32 path (exact vs reference; the right choice on v5e).
    out = jax.block_until_ready(mog_netG_forward(x, params))
    ref = reference_forward(x, params)
    assert out.shape == (batch, nX), out.shape
    assert jnp.allclose(out, ref, atol=1e-5, rtol=1e-5), "f32 mismatch vs reference"

    # bf16 MXU/EUP path (v6e/v7x throughput option) — looser tolerance vs f32 ref.
    out_bf16 = jax.block_until_ready(mog_netG_forward(x, params, use_bf16=True))
    assert out_bf16.shape == (batch, nX), out_bf16.shape
    assert jnp.allclose(out_bf16, ref, atol=5e-2, rtol=5e-2), "bf16 mismatch vs reference"

    print("KERNEL_OK")
</pallas_src>

<mosaic_0001>
module attributes {stable_mosaic.version = 11 : i64} {
  func.func @_mog_netg_kernel(%arg0: i32, %arg1: memref<128x8xf32, #tpu.memory_space<vmem>>, %arg2: memref<32x8xf32, #tpu.memory_space<vmem>>, %arg3: memref<32x1xf32, #tpu.memory_space<vmem>>, %arg4: memref<32x32xf32, #tpu.memory_space<vmem>>, %arg5: memref<32x1xf32, #tpu.memory_space<vmem>>, %arg6: memref<32x32xf32, #tpu.memory_space<vmem>>, %arg7: memref<32x1xf32, #tpu.memory_space<vmem>>, %arg8: memref<32x32xf32, #tpu.memory_space<vmem>>, %arg9: memref<32x1xf32, #tpu.memory_space<vmem>>, %arg10: memref<2x32xf32, #tpu.memory_space<vmem>>, %arg11: memref<2x1xf32, #tpu.memory_space<vmem>>, %arg12: memref<2x128xf32, #tpu.memory_space<vmem>>) attributes {dimension_semantics = [#tpu.dimension_semantics<parallel>], iteration_bounds = array<i64: 1>, scalar_prefetch = 0 : i64, scratch_operands = 0 : i64, tpu.core_type = #tpu.core_type<tc>, window_params = [{transform_indices = @transform_0, window_bounds = array<i64: 128, 8>}, {pipeline_mode = #tpu.pipeline_mode<synchronous>, transform_indices = @transform_1, window_bounds = array<i64: 32, 8>}, {pipeline_mode = #tpu.pipeline_mode<synchronous>, transform_indices = @transform_2, window_bounds = array<i64: 32, 1>}, {pipeline_mode = #tpu.pipeline_mode<synchronous>, transform_indices = @transform_3, window_bounds = array<i64: 32, 32>}, {pipeline_mode = #tpu.pipeline_mode<synchronous>, transform_indices = @transform_4, window_bounds = array<i64: 32, 1>}, {pipeline_mode = #tpu.pipeline_mode<synchronous>, transform_indices = @transform_5, window_bounds = array<i64: 32, 32>}, {pipeline_mode = #tpu.pipeline_mode<synchronous>, transform_indices = @transform_6, window_bounds = array<i64: 32, 1>}, {pipeline_mode = #tpu.pipeline_mode<synchronous>, transform_indices = @transform_7, window_bounds = array<i64: 32, 32>}, {pipeline_mode = #tpu.pipeline_mode<synchronous>, transform_indices = @transform_8, window_bounds = array<i64: 32, 1>}, {pipeline_mode = #tpu.pipeline_mode<synchronous>, transform_indices = @transform_9, window_bounds = array<i64: 2, 32>}, {pipeline_mode = #tpu.pipeline_mode<synchronous>, transform_indices = @transform_10, window_bounds = array<i64: 2, 1>}, {transform_indices = @transform_11, window_bounds = array<i64: 2, 128>}]} {
    %c0 = arith.constant 0 : index
    %c0_0 = arith.constant 0 : index
    %0 = vector.load %arg2[%c0, %c0_0] : memref<32x8xf32, #tpu.memory_space<vmem>>, vector<32x8xf32>
    %c0_1 = arith.constant 0 : index
    %c0_2 = arith.constant 0 : index
    %1 = vector.load %arg3[%c0_1, %c0_2] : memref<32x1xf32, #tpu.memory_space<vmem>>, vector<32x1xf32>
    %c0_3 = arith.constant 0 : index
    %c0_4 = arith.constant 0 : index
    %2 = vector.load %arg4[%c0_3, %c0_4] : memref<32x32xf32, #tpu.memory_space<vmem>>, vector<32x32xf32>
    %c0_5 = arith.constant 0 : index
    %c0_6 = arith.constant 0 : index
    %3 = vector.load %arg5[%c0_5, %c0_6] : memref<32x1xf32, #tpu.memory_space<vmem>>, vector<32x1xf32>
    %c0_7 = arith.constant 0 : index
    %c0_8 = arith.constant 0 : index
    %4 = vector.load %arg6[%c0_7, %c0_8] : memref<32x32xf32, #tpu.memory_space<vmem>>, vector<32x32xf32>
    %c0_9 = arith.constant 0 : index
    %c0_10 = arith.constant 0 : index
    %5 = vector.load %arg7[%c0_9, %c0_10] : memref<32x1xf32, #tpu.memory_space<vmem>>, vector<32x1xf32>
    %c0_11 = arith.constant 0 : index
    %c0_12 = arith.constant 0 : index
    %6 = vector.load %arg8[%c0_11, %c0_12] : memref<32x32xf32, #tpu.memory_space<vmem>>, vector<32x32xf32>
    %c0_13 = arith.constant 0 : index
    %c0_14 = arith.constant 0 : index
    %7 = vector.load %arg9[%c0_13, %c0_14] : memref<32x1xf32, #tpu.memory_space<vmem>>, vector<32x1xf32>
    %c0_15 = arith.constant 0 : index
    %c0_16 = arith.constant 0 : index
    %8 = vector.load %arg10[%c0_15, %c0_16] : memref<2x32xf32, #tpu.memory_space<vmem>>, vector<2x32xf32>
    %c0_17 = arith.constant 0 : index
    %c0_18 = arith.constant 0 : index
    %9 = vector.load %arg11[%c0_17, %c0_18] : memref<2x1xf32, #tpu.memory_space<vmem>>, vector<2x1xf32>
    %c0_19 = arith.constant 0 : index
    %c0_20 = arith.constant 0 : index
    %10 = vector.load %arg1[%c0_19, %c0_20] : memref<128x8xf32, #tpu.memory_space<vmem>>, vector<128x8xf32>
    %cst = arith.constant dense<0.000000e+00> : vector<32x128xf32>
    %11 = tpu.matmul %0, %10, %cst {dimension_numbers = #tpu.dot_dimension_numbers<[1], [1], [0], [0], [0, 0, 1, 0], [], []>} : vector<32x8xf32>, vector<128x8xf32>, vector<32x128xf32> -> vector<32x128xf32>
    %12 = vector.broadcast %1 : vector<32x1xf32> to vector<32x128xf32>
    %13 = arith.addf %11, %12 : vector<32x128xf32>
    %14 = math.tanh %13 : vector<32x128xf32>
    %cst_21 = arith.constant dense<0.000000e+00> : vector<32x128xf32>
    %15 = tpu.matmul %2, %14, %cst_21 {dimension_numbers = #tpu.dot_dimension_numbers<[1], [0], [0], [1], [0, 0, 1, 1], [], []>} : vector<32x32xf32>, vector<32x128xf32>, vector<32x128xf32> -> vector<32x128xf32>
    %16 = vector.broadcast %3 : vector<32x1xf32> to vector<32x128xf32>
    %17 = arith.addf %15, %16 : vector<32x128xf32>
    %18 = math.tanh %17 : vector<32x128xf32>
    %cst_22 = arith.constant dense<0.000000e+00> : vector<32x128xf32>
    %19 = tpu.matmul %4, %18, %cst_22 {dimension_numbers = #tpu.dot_dimension_numbers<[1], [0], [0], [1], [0, 0, 1, 1], [], []>} : vector<32x32xf32>, vector<32x128xf32>, vector<32x128xf32> -> vector<32x128xf32>
    %20 = vector.broadcast %5 : vector<32x1xf32> to vector<32x128xf32>
    %21 = arith.addf %19, %20 : vector<32x128xf32>
    %22 = math.tanh %21 : vector<32x128xf32>
    %cst_23 = arith.constant dense<0.000000e+00> : vector<32x128xf32>
    %23 = tpu.matmul %6, %22, %cst_23 {dimension_numbers = #tpu.dot_dimension_numbers<[1], [0], [0], [1], [0, 0, 1, 1], [], []>} : vector<32x32xf32>, vector<32x128xf32>, vector<32x128xf32> -> vector<32x128xf32>
    %24 = vector.broadcast %7 : vector<32x1xf32> to vector<32x128xf32>
    %25 = arith.addf %23, %24 : vector<32x128xf32>
    %26 = math.tanh %25 : vector<32x128xf32>
    %cst_24 = arith.constant dense<0.000000e+00> : vector<2x128xf32>
    %27 = tpu.matmul %8, %26, %cst_24 {dimension_numbers = #tpu.dot_dimension_numbers<[1], [0], [0], [1], [0, 0, 1, 1], [], []>} : vector<2x32xf32>, vector<32x128xf32>, vector<2x128xf32> -> vector<2x128xf32>
    %28 = vector.broadcast %9 : vector<2x1xf32> to vector<2x128xf32>
    %29 = arith.addf %27, %28 : vector<2x128xf32>
    %c0_25 = arith.constant 0 : index
    %c0_26 = arith.constant 0 : index
    %30 = vector.load %arg12[%c0_25, %c0_26] : memref<2x128xf32, #tpu.memory_space<vmem>>, vector<2x128xf32>
    tpu.vector_store %arg12[%c0_25, %c0_26], %29 {strides = array<i32>} : memref<2x128xf32, #tpu.memory_space<vmem>>, vector<2x128xf32>,
    return
  }
  func.func @transform_0(%arg0: i32) -> (i32, i32) {
    %c0_i32 = arith.constant 0 : i32
    %c0_i32_0 = arith.constant 0 : i32
    return %arg0, %c0_i32 : i32, i32
  }
  func.func @transform_1(%arg0: i32) -> (i32, i32) {
    %c0_i32 = arith.constant 0 : i32
    %c0_i32_0 = arith.constant 0 : i32
    %c0_i32_1 = arith.constant 0 : i32
    return %c0_i32, %c0_i32_0 : i32, i32
  }
  func.func @transform_2(%arg0: i32) -> (i32, i32) {
    %c0_i32 = arith.constant 0 : i32
    %c0_i32_0 = arith.constant 0 : i32
    %c0_i32_1 = arith.constant 0 : i32
    return %c0_i32, %c0_i32_0 : i32, i32
  }
  func.func @transform_3(%arg0: i32) -> (i32, i32) {
    %c0_i32 = arith.constant 0 : i32
    %c0_i32_0 = arith.constant 0 : i32
    %c0_i32_1 = arith.constant 0 : i32
    return %c0_i32, %c0_i32_0 : i32, i32
  }
  func.func @transform_4(%arg0: i32) -> (i32, i32) {
    %c0_i32 = arith.constant 0 : i32
    %c0_i32_0 = arith.constant 0 : i32
    %c0_i32_1 = arith.constant 0 : i32
    return %c0_i32, %c0_i32_0 : i32, i32
  }
  func.func @transform_5(%arg0: i32) -> (i32, i32) {
    %c0_i32 = arith.constant 0 : i32
    %c0_i32_0 = arith.constant 0 : i32
    %c0_i32_1 = arith.constant 0 : i32
    return %c0_i32, %c0_i32_0 : i32, i32
  }
  func.func @transform_6(%arg0: i32) -> (i32, i32) {
    %c0_i32 = arith.constant 0 : i32
    %c0_i32_0 = arith.constant 0 : i32
    %c0_i32_1 = arith.constant 0 : i32
    return %c0_i32, %c0_i32_0 : i32, i32
  }
  func.func @transform_7(%arg0: i32) -> (i32, i32) {
    %c0_i32 = arith.constant 0 : i32
    %c0_i32_0 = arith.constant 0 : i32
    %c0_i32_1 = arith.constant 0 : i32
    return %c0_i32, %c0_i32_0 : i32, i32
  }
  func.func @transform_8(%arg0: i32) -> (i32, i32) {
    %c0_i32 = arith.constant 0 : i32
    %c0_i32_0 = arith.constant 0 : i32
    %c0_i32_1 = arith.constant 0 : i32
    return %c0_i32, %c0_i32_0 : i32, i32
  }
  func.func @transform_9(%arg0: i32) -> (i32, i32) {
    %c0_i32 = arith.constant 0 : i32
    %c0_i32_0 = arith.constant 0 : i32
    %c0_i32_1 = arith.constant 0 : i32
    return %c0_i32, %c0_i32_0 : i32, i32
  }
  func.func @transform_10(%arg0: i32) -> (i32, i32) {
    %c0_i32 = arith.constant 0 : i32
    %c0_i32_0 = arith.constant 0 : i32
    %c0_i32_1 = arith.constant 0 : i32
    return %c0_i32, %c0_i32_0 : i32, i32
  }
  func.func @transform_11(%arg0: i32) -> (i32, i32) {
    %c0_i32 = arith.constant 0 : i32
    %c0_i32_0 = arith.constant 0 : i32
    return %c0_i32, %arg0 : i32, i32
  }
}

</mosaic_0001>

<bundles_post_ra>
// kernel: mog_netG_forward.1
= control target key start
LH: loop header
LB: loop body
LE: loop exit
PB: predicated region body
PF: predicated region fallthrough
CT: control target
= control target key end

     0   :  { %vm108_vm0 = vcmask 64512   ;;  %v915_v2 = vmov 0   ;;  %vm278_vm1 = vcmask 261120   ;;  %vm917_vm2 = vmmov 0   ;;  %s1180_s0 = inlined_call_operand.vmem [shape: f32[128,8], index: 0, kind: input, shape index: {}]   ;;  %s1181_s1 = inlined_call_operand.vmem [shape: f32[32,8], index: 1, kind: input, shape index: {}]   ;;  %s1182_s2 = inlined_call_operand.vmem [shape: f32[32,1], index: 2, kind: input, shape index: {}]   ;;  %s1183_s4 = inlined_call_operand.vmem [shape: f32[32,1], index: 4, kind: input, shape index: {}]   ;;  %s1184_s6 = inlined_call_operand.vmem [shape: f32[32,1], index: 6, kind: input, shape index: {}]   ;;  %s1185_s8 = inlined_call_operand.vmem [shape: f32[32,1], index: 8, kind: input, shape index: {}]   ;;  %s1186_s10 = inlined_call_operand.vmem [shape: f32[2,1], index: 10, kind: input, shape index: {}]   ;;  %s1187_s3 = inlined_call_operand.vmem [shape: f32[32,32], index: 3, kind: input, shape index: {}]   ;;  %s1188_s5 = inlined_call_operand.vmem [shape: f32[32,32], index: 5, kind: input, shape index: {}]   ;;  %s1189_s7 = inlined_call_operand.vmem [shape: f32[32,32], index: 7, kind: input, shape index: {}]   ;;  %s1190_s9 = inlined_call_operand.vmem [shape: f32[2,32], index: 9, kind: input, shape index: {}]   ;;  %s1191_s11 = inlined_call_operand.vmem [shape: f32[2,128], index: 11, kind: output, shape index: {}]  }
   0x1   :  { %v87_v0 = vld [vmem:[%s1180_s0 + $0x78] sm:$0xff]  ;;  %v86_v1 = vld [vmem:[%s1180_s0 + $0x70] sm:$0xff]  ;;  %881 = vset.pattern.permute.xlu0 %v915_v2  ;;  %882 = vset.pattern.permute.xlu1 %v915_v2  ;;  %v85_v3 = vld [vmem:[%s1180_s0 + $0x68] sm:$0xff] }
   0x2   :  { %787 = vmatprep.subr.msk.mxu0 %vm108_vm0, %v87_v0  ;;  %v38_v4 = vld [vmem:[%s1181_s1] sm:$0xff]  ;;  %v45_v5 = vld [vmem:[%s1182_s2 + $0x18] sm:$0xff]  ;;  %v43_v6 = vld [vmem:[%s1182_s2 + $0x8] sm:$0xff] }
   0x3   :  { %788 = vmatpush3.xpose.msk.msra.mxu0 %vm108_vm0, %v87_v0  ;;  %819 = vmatprep.mubr.msk.f32.mxu0 %vm108_vm0, %v38_v4  ;;  %v84_v7 = vld [vmem:[%s1180_s0 + $0x60] sm:$0xff]  ;;  %v44_v8 = vld [vmem:[%s1182_s2 + $0x10] sm:$0xff]  ;;  %v83_v10 = vld [vmem:[%s1180_s0 + $0x58] sm:$0xff] }
   0x4   :  { %789 = vmatprep.subr.msk.mxu0 %vm108_vm0, %v86_v1  ;;  %105 = vperm.xlu0 %881, %v45_v5   ;;  %v42_v9 = vld [vmem:[%s1182_s2] sm:$0xff]  ;;  %v53_v11 = vld [vmem:[%s1183_s4 + $0x18] sm:$0xff]  ;;  %v52_v12 = vld [vmem:[%s1183_s4 + $0x10] sm:$0xff] }
   0x5   :  { %95 = vperm.xlu1 %882, %v43_v6   ;;  %v82_v13 = vld [vmem:[%s1180_s0 + $0x50] sm:$0xff]  ;;  %v51_v14 = vld [vmem:[%s1183_s4 + $0x8] sm:$0xff]  ;;  %v50_v15 = vld [vmem:[%s1183_s4] sm:$0xff] }
   0x6   :  { %v81_v16 = vld [vmem:[%s1180_s0 + $0x48] sm:$0xff]  ;;  %v61_v17 = vld [vmem:[%s1184_s6 + $0x18] sm:$0xff]  ;;  %v60_v18 = vld [vmem:[%s1184_s6 + $0x10] sm:$0xff] }
   0x7   :  { %790 = vmatpush3.xpose.msk.msra.mxu0 %vm108_vm0, %v86_v1  ;;  %v80_v19 = vld [vmem:[%s1180_s0 + $0x40] sm:$0xff]  ;;  %v59_v20 = vld [vmem:[%s1184_s6 + $0x8] sm:$0xff]  ;;  %v79_v22 = vld [vmem:[%s1180_s0 + $0x38] sm:$0xff] }
   0x8   :  { %791 = vmatprep.subr.msk.mxu0 %vm108_vm0, %v85_v3  ;;  %100 = vperm.xlu0 %881, %v44_v8   ;;  %v58_v21 = vld [vmem:[%s1184_s6] sm:$0xff]  ;;  %v69_v23 = vld [vmem:[%s1185_s8 + $0x18] sm:$0xff]  ;;  %v68_v24 = vld [vmem:[%s1185_s8 + $0x10] sm:$0xff] }
   0x9   :  { %90 = vperm.xlu1 %882, %v42_v9   ;;  %v78_v25 = vld [vmem:[%s1180_s0 + $0x30] sm:$0xff]  ;;  %v67_v26 = vld [vmem:[%s1185_s8 + $0x8] sm:$0xff]  ;;  %v66_v27 = vld [vmem:[%s1185_s8] sm:$0xff] }
   0xa   :  { %v77_v28 = vld [vmem:[%s1180_s0 + $0x28] sm:$0xff]  ;;  %v71_v29 = vld [vmem:[%s1186_s10] sm:$0x3]  ;;  %v75_v31 = vld [vmem:[%s1180_s0 + $0x18] sm:$0xff] }
   0xb   :  { %792 = vmatpush3.xpose.msk.msra.mxu0 %vm108_vm0, %v85_v3  ;;  %v76_v30 = vld [vmem:[%s1180_s0 + $0x20] sm:$0xff]  ;;  %v74_v32 = vld [vmem:[%s1180_s0 + $0x10] sm:$0xff]  ;;  %v73_v33 = vld [vmem:[%s1180_s0 + $0x8] sm:$0xff] }
   0xc   :  { %793 = vmatprep.subr.msk.mxu0 %vm108_vm0, %v84_v7  ;;  %275 = vperm.xlu0 %881, %v53_v11   ;;  %v72_v34 = vld [vmem:[%s1180_s0] sm:$0xff]  ;;  %v39_v35 = vld [vmem:[%s1181_s1 + $0x8] sm:$0xff]  ;;  %v40_v36 = vld [vmem:[%s1181_s1 + $0x10] sm:$0xff] }
   0xd   :  { %270 = vperm.xlu1 %882, %v52_v12   ;;  %v41_v37 = vld [vmem:[%s1181_s1 + $0x18] sm:$0xff]  ;;  %v46_v38 = vld [vmem:[%s1187_s3] sm:$0xff]  ;;  %v47_v55 = vld [vmem:[%s1187_s3 + $0x8] sm:$0xff] }
   0xe   :  { %833 = vmatprep.mubr.msk.f32.mxu1 %vm278_vm1, %v46_v38  ;;  %v48_v56 = vld [vmem:[%s1187_s3 + $0x10] sm:$0xff]  ;;  %v49_v57 = vld [vmem:[%s1187_s3 + $0x18] sm:$0xff]  ;;  %v54_v58 = vld [vmem:[%s1188_s5] sm:$0xff] }
   0xf   :  { %794 = vmatpush3.xpose.msk.msra.mxu0 %vm108_vm0, %v84_v7  ;;  %v55_v11 = vld [vmem:[%s1188_s5 + $0x8] sm:$0xff]  ;;  %v56_v12 = vld [vmem:[%s1188_s5 + $0x10] sm:$0xff] }
  0x10   :  { %795 = vmatprep.subr.msk.mxu0 %vm108_vm0, %v83_v10  ;;  %265 = vperm.xlu0 %881, %v51_v14   ;;  %v62_v14 = vld [vmem:[%s1189_s7] sm:$0xff] }
  0x11   :  { %260 = vperm.xlu1 %882, %v50_v15  }
  0x13   :  { %796 = vmatpush3.xpose.msk.msra.mxu0 %vm108_vm0, %v83_v10 }
  0x14   :  { %797 = vmatprep.subr.msk.mxu0 %vm108_vm0, %v82_v13  ;;  %397 = vperm.xlu0 %881, %v61_v17  }
  0x15   :  { %392 = vperm.xlu1 %882, %v60_v18  }
  0x17   :  { %798 = vmatpush3.xpose.msk.msra.mxu0 %vm108_vm0, %v82_v13  ;;  %v57_v13 = vld [vmem:[%s1188_s5 + $0x18] sm:$0xff] }
  0x18   :  { %799 = vmatprep.subr.msk.mxu0 %vm108_vm0, %v81_v16  ;;  %387 = vperm.xlu0 %881, %v59_v20  }
  0x19   :  { %382 = vperm.xlu1 %882, %v58_v21  }
  0x1b   :  { %800 = vmatpush3.xpose.msk.msra.mxu0 %vm108_vm0, %v81_v16 }
  0x1c   :  { %801 = vmatprep.subr.msk.mxu0 %vm108_vm0, %v80_v19  ;;  %518 = vperm.xlu0 %881, %v69_v23  }
  0x1d   :  { %513 = vperm.xlu1 %882, %v68_v24  }
  0x1f   :  { %802 = vmatpush3.xpose.msk.msra.mxu0 %vm108_vm0, %v80_v19 }
  0x20   :  { %803 = vmatprep.subr.msk.mxu0 %vm108_vm0, %v79_v22  ;;  %508 = vperm.xlu0 %881, %v67_v26  }
  0x21   :  { %503 = vperm.xlu1 %882, %v66_v27  }
  0x23   :  { %804 = vmatpush3.xpose.msk.msra.mxu0 %vm108_vm0, %v79_v22 }
  0x24   :  { %805 = vmatprep.subr.msk.mxu0 %vm108_vm0, %v78_v25  ;;  %624 = vperm.xlu0 %881, %v71_v29  }
  0x27   :  { %806 = vmatpush3.xpose.msk.msra.mxu0 %vm108_vm0, %v78_v25 }
  0x28   :  { %807 = vmatprep.subr.msk.mxu0 %vm108_vm0, %v77_v28 }
  0x2b   :  { %808 = vmatpush3.xpose.msk.msra.mxu0 %vm108_vm0, %v77_v28 }
  0x2c   :  { %809 = vmatprep.subr.msk.mxu0 %vm108_vm0, %v76_v30 }
  0x2f   :  { %810 = vmatpush3.xpose.msk.msra.mxu0 %vm108_vm0, %v76_v30 }
  0x30   :  { %811 = vmatprep.subr.msk.mxu0 %vm108_vm0, %v75_v31 }
  0x33   :  { %812 = vmatpush3.xpose.msk.msra.mxu0 %vm108_vm0, %v75_v31  ;;  %v63_v31 = vld [vmem:[%s1189_s7 + $0x8] sm:$0xff] }
  0x34   :  { %813 = vmatprep.subr.msk.mxu0 %vm108_vm0, %v74_v32 }
  0x37   :  { %814 = vmatpush3.xpose.msk.msra.mxu0 %vm108_vm0, %v74_v32  ;;  %v64_v32 = vld [vmem:[%s1189_s7 + $0x10] sm:$0xff] }
  0x38   :  { %815 = vmatprep.subr.msk.mxu0 %vm108_vm0, %v73_v33 }
  0x3b   :  { %816 = vmatpush3.xpose.msk.msra.mxu0 %vm108_vm0, %v73_v33  ;;  %v65_v33 = vld [vmem:[%s1189_s7 + $0x18] sm:$0xff] }
  0x3c   :  { %817 = vmatprep.subr.msk.mxu0 %vm108_vm0, %v72_v34 }
  0x3f   :  { %818 = vmatpush3.xpose.msk.msra.mxu0 %vm108_vm0, %v72_v34  ;;  %v916_v34 = vmov 0.0  }
  0x42   :  { %820 = vmatmul.mubr.msk.f32.vlgmr.msra.gmra.mxu0 %vm108_vm0, %v39_v35 }
  0x43   :  { %822 = vmatprep.mubr.msk.f32.mxu0 %vm108_vm0, %v40_v36 }
  0x46   :  { %823 = vmatmul.mubr.msk.f32.gmra.mxu0 %vm108_vm0, %v41_v37 }
  0x7f   :  { %v106_v39 = vpop.permute.xlu0 %105 }
  0x80   :  { %v96_v41 = vpop.permute.xlu1 %95 }
  0x83   :  { %v101_v45 = vpop.permute.xlu0 %100 }
  0x84   :  { %v91_v49 = vpop.permute.xlu1 %90 }
  0x87   :  { %v276_v59 = vpop.permute.xlu0 %275 }
  0x88   :  { %v271_v61 = vpop.permute.xlu1 %270 }
  0x8b   :  { %v266_v1 = vpop.permute.xlu0 %265 }
  0x8c   :  { %v261_v5 = vpop.permute.xlu1 %260 }
  0x8f   :  { %v398_v15 = vpop.permute.xlu0 %397 }
  0x90   :  { %v393_v17 = vpop.permute.xlu1 %392 }
  0x93   :  { %v388_v21 = vpop.permute.xlu0 %387 }
  0x94   :  { %v383_v25 = vpop.permute.xlu1 %382 }
  0x97   :  { %v519_v35 = vpop.permute.xlu0 %518 }
  0x98   :  { %v514_v37 = vpop.permute.xlu1 %513 }
 0x102   :  { %v821_v40 = vpop.f32.mrf.mxu0 }
 0x103   :  { %v241_v47 = vadd.f32 %v821_v40, %v96_v41  ;;  %v509_v41 = vpop.permute.xlu0 %508 }
 0x104   :  { %v235_v42 = vpop.f32.mrf.mxu0 }
 0x105   :  { %v236_v50 = vadd.f32 %v235_v42, %v91_v49 }
 0x106   :  { %v824_v43 = vpop.f32.mrf.mxu0 }
 0x107   :  { %v251_v44 = vadd.f32 %v824_v43, %v106_v39 }
 0x108   :  { %v245_v46 = vpop.f32.mrf.mxu0 }
 0x109   :  { %883 = vtanh.f32 %v251_v44  ;;  %v246_v48 = vadd.f32 %v245_v46, %v101_v45  ;;  %v504_v45 = vpop.permute.xlu1 %503 }
 0x10b   :  { %885 = vtanh.f32 %v246_v48 }
 0x10c   :  { %887 = vtanh.f32 %v241_v47 }
 0x10d   :  { %889 = vtanh.f32 %v236_v50  ;;  %v70_v50 = vld [vmem:[%s1190_s9] sm:$0x3] }
 0x116   :  { %v884_v51 = vpop.eup %883 }
 0x117   :  { %825 = vmatprep.subr.mxu1 %v884_v51 }
 0x118   :  { %v886_v52 = vpop.eup %885  ;;  %826 = vmatpush3.msra.mxu1 %v884_v51 }
 0x119   :  { %827 = vmatprep.subr.mxu1 %v886_v52  ;;  %v888_v53 = vpop.eup %887 }
 0x11a   :  { %828 = vmatpush3.msra.mxu1 %v886_v52  ;;  %v890_v54 = vpop.eup %889  ;;  %v625_v52 = vpop.permute.xlu0 %624 }
 0x11b   :  { %829 = vmatprep.subr.mxu1 %v888_v53 }
 0x11c   :  { %830 = vmatpush3.msra.mxu1 %v888_v53 }
 0x11d   :  { %831 = vmatprep.subr.mxu1 %v890_v54 }
 0x11e   :  { %832 = vmatpush3.msra.mxu1 %v890_v54 }
 0x11f   :  { %834 = vmatmul.mubr.msk.f32.vlgmr.msra.gmra.mxu1 %vm278_vm1, %v47_v55 }
 0x120   :  { %836 = vmatprep.mubr.msk.f32.mxu1 %vm278_vm1, %v48_v56 }
 0x123   :  { %837 = vmatmul.mubr.msk.f32.gmra.mxu1 %vm278_vm1, %v49_v57 }
 0x124   :  { %847 = vmatprep.mubr.msk.f32.mxu1 %vm278_vm1, %v54_v58 }
 0x1df   :  { %v835_v60 = vpop.f32.mrf.mxu1 }
 0x1e0   :  { %v363_v3 = vadd.f32 %v835_v60, %v266_v1 }
 0x1e1   :  { %v357_v62 = vpop.f32.mrf.mxu1 }
 0x1e2   :  { %v358_v6 = vadd.f32 %v357_v62, %v261_v5 }
 0x1e3   :  { %v838_v63 = vpop.f32.mrf.mxu1 }
 0x1e4   :  { %v373_v0 = vadd.f32 %v838_v63, %v276_v59 }
 0x1e5   :  { %v367_v2 = vpop.f32.mrf.mxu1 }
 0x1e6   :  { %891 = vtanh.f32 %v373_v0  ;;  %v368_v4 = vadd.f32 %v367_v2, %v271_v61 }
 0x1e8   :  { %893 = vtanh.f32 %v368_v4 }
 0x1e9   :  { %895 = vtanh.f32 %v363_v3 }
 0x1ea   :  { %897 = vtanh.f32 %v358_v6 }
 0x1f3   :  { %v892_v7 = vpop.eup %891 }
 0x1f4   :  { %839 = vmatprep.subr.mxu1 %v892_v7 }
 0x1f5   :  { %v894_v8 = vpop.eup %893  ;;  %840 = vmatpush3.msra.mxu1 %v892_v7 }
 0x1f6   :  { %841 = vmatprep.subr.mxu1 %v894_v8  ;;  %v896_v9 = vpop.eup %895 }
 0x1f7   :  { %842 = vmatpush3.msra.mxu1 %v894_v8  ;;  %v898_v10 = vpop.eup %897 }
 0x1f8   :  { %843 = vmatprep.subr.mxu1 %v896_v9 }
 0x1f9   :  { %844 = vmatpush3.msra.mxu1 %v896_v9 }
 0x1fa   :  { %845 = vmatprep.subr.mxu1 %v898_v10 }
 0x1fb   :  { %846 = vmatpush3.msra.mxu1 %v898_v10 }
 0x1fc   :  { %848 = vmatmul.mubr.msk.f32.vlgmr.msra.gmra.mxu1 %vm278_vm1, %v55_v11 }
 0x1fd   :  { %850 = vmatprep.mubr.msk.f32.mxu1 %vm278_vm1, %v56_v12 }
 0x200   :  { %851 = vmatmul.mubr.msk.f32.gmra.mxu1 %vm278_vm1, %v57_v13 }
 0x201   :  { %861 = vmatprep.mubr.msk.f32.mxu1 %vm278_vm1, %v62_v14 }
 0x2bc   :  { %v849_v16 = vpop.f32.mrf.mxu1 }
 0x2bd   :  { %v484_v23 = vadd.f32 %v849_v16, %v388_v21 }
 0x2be   :  { %v478_v18 = vpop.f32.mrf.mxu1 }
 0x2bf   :  { %v479_v26 = vadd.f32 %v478_v18, %v383_v25 }
 0x2c0   :  { %v852_v19 = vpop.f32.mrf.mxu1 }
 0x2c1   :  { %v494_v20 = vadd.f32 %v852_v19, %v398_v15 }
 0x2c2   :  { %v488_v22 = vpop.f32.mrf.mxu1 }
 0x2c3   :  { %899 = vtanh.f32 %v494_v20  ;;  %v489_v24 = vadd.f32 %v488_v22, %v393_v17 }
 0x2c5   :  { %901 = vtanh.f32 %v489_v24 }
 0x2c6   :  { %903 = vtanh.f32 %v484_v23 }
 0x2c7   :  { %905 = vtanh.f32 %v479_v26 }
 0x2d0   :  { %v900_v27 = vpop.eup %899 }
 0x2d1   :  { %853 = vmatprep.subr.mxu1 %v900_v27 }
 0x2d2   :  { %v902_v28 = vpop.eup %901  ;;  %854 = vmatpush3.msra.mxu1 %v900_v27 }
 0x2d3   :  { %855 = vmatprep.subr.mxu1 %v902_v28  ;;  %v904_v29 = vpop.eup %903 }
 0x2d4   :  { %856 = vmatpush3.msra.mxu1 %v902_v28  ;;  %v906_v30 = vpop.eup %905 }
 0x2d5   :  { %857 = vmatprep.subr.mxu1 %v904_v29 }
 0x2d6   :  { %858 = vmatpush3.msra.mxu1 %v904_v29 }
 0x2d7   :  { %859 = vmatprep.subr.mxu1 %v906_v30 }
 0x2d8   :  { %860 = vmatpush3.msra.mxu1 %v906_v30 }
 0x2d9   :  { %862 = vmatmul.mubr.msk.f32.vlgmr.msra.gmra.mxu1 %vm278_vm1, %v63_v31  ;;  %867 = vmatprep.subr.mxu1 %v916_v34 }
 0x2da   :  { %864 = vmatprep.mubr.msk.f32.mxu1 %vm278_vm1, %v64_v32 }
 0x2dd   :  { %865 = vmatmul.mubr.msk.f32.gmra.mxu1 %vm278_vm1, %v65_v33 }
 0x2de   :  { %875 = vmatprep.mubr.msk.f32.mxu1 %vm917_vm2, %v916_v34 }
 0x399   :  { %v863_v36 = vpop.f32.mrf.mxu1 }
 0x39a   :  { %v605_v43 = vadd.f32 %v863_v36, %v509_v41 }
 0x39b   :  { %v599_v38 = vpop.f32.mrf.mxu1 }
 0x39c   :  { %v600_v46 = vadd.f32 %v599_v38, %v504_v45 }
 0x39d   :  { %v866_v39 = vpop.f32.mrf.mxu1 }
 0x39e   :  { %v615_v40 = vadd.f32 %v866_v39, %v519_v35 }
 0x39f   :  { %v609_v42 = vpop.f32.mrf.mxu1 }
 0x3a0   :  { %907 = vtanh.f32 %v615_v40  ;;  %v610_v44 = vadd.f32 %v609_v42, %v514_v37 }
 0x3a2   :  { %909 = vtanh.f32 %v610_v44 }
 0x3a3   :  { %911 = vtanh.f32 %v605_v43 }
 0x3a4   :  { %913 = vtanh.f32 %v600_v46 }
 0x3ad   :  { %v908_v47 = vpop.eup %907 }
 0x3ae   :  { %868 = vmatpush3.msra.mxu1 %v908_v47 }
 0x3af   :  { %v910_v48 = vpop.eup %909  ;;  %869 = vmatprep.subr.mxu1 %v916_v34 }
 0x3b0   :  { %870 = vmatpush3.msra.mxu1 %v910_v48  ;;  %v912_v49 = vpop.eup %911 }
 0x3b1   :  { %871 = vmatprep.subr.mxu1 %v916_v34  ;;  %v914_v51 = vpop.eup %913 }
 0x3b2   :  { %872 = vmatpush3.msra.mxu1 %v912_v49 }
 0x3b3   :  { %873 = vmatprep.subr.mxu1 %v916_v34 }
 0x3b4   :  { %874 = vmatpush3.msra.mxu1 %v914_v51 }
 0x3b5   :  { %876 = vmatmul.mubr.msk.f32.vlgmr.msra.gmra.mxu1 %vm278_vm1, %v70_v50 }
 0x475   :  { %v696_v53 = vpop.f32.mrf.mxu1 }
 0x476   :  { %v697_v54 = vadd.f32 %v696_v53, %v625_v52 }
 0x477   :  { %v877_v55 = vpop.f32.mrf.mxu1 }
 0x478   :  { %700 = vst [vmem:[%s1191_s11] sm:$0x3] %v697_v54 }

</bundles_post_ra>
